<compile_context>
chip_gen: v7x
topology: tpu7x:2x2x1
jax: 0.10.0
libtpu: 0.0.40
codegen_flags: <defaults>
</compile_context>

<pallas_src>
import math
import jax
import jax.numpy as jnp
from jax import lax
from jax.experimental import pallas as pl
from jax.experimental.pallas import tpu as pltpu


def _round_up(x, m):
    return ((x + m - 1) // m) * m


# ----------------------------- Pallas kernel --------------------------------

def hfp_critic_kernel(hfp_ref, feat_ref, wt_ref, bt_ref, *refs):
    """Fused stand-in transformer projection + critic MLP for one row tile.

    refs = (w0a, w0b, b0, w1, b1, ..., w_{L-1}, b_{L-1}, wL_row, bL, o_ref)
      w0a: (d_model, hidden)  first-layer weight rows multiplied by est_hfp
      w0b: (img_dim, hidden)  first-layer weight rows multiplied by hfp_feat
      wL_row: (1, hidden)     final hidden->1 weight stored as a row
      bL: (1, 1)
      o_ref: (1, tm)          lane-dense output block (rows on the lane axis)
    """
    o_ref = refs[-1]
    w0a_ref, w0b_ref, b0_ref = refs[0], refs[1], refs[2]
    wl_ref, bl_ref = refs[-3], refs[-2]
    mid = refs[3:-3]

    f32 = jnp.float32

    # Stand-in transformer projection: est = tanh(x @ Wt + bt)  (tanh -> EUP).
    est = jnp.tanh(
        jnp.dot(hfp_ref[...].astype(f32), wt_ref[...].astype(f32),
                preferred_element_type=f32)
        + bt_ref[...].astype(f32))

    # Fused concat + first critic layer:
    #   h = concat(est, feat) @ W0 + b0
    #     = est @ W0[:d_model] + feat @ W0[d_model:] + b0
    h = (jnp.dot(est, w0a_ref[...].astype(f32), preferred_element_type=f32)
         + jnp.dot(feat_ref[...].astype(f32), w0b_ref[...].astype(f32),
                   preferred_element_type=f32)
         + b0_ref[...].astype(f32))
    h = jnp.maximum(h, 0.0)

    # Middle hidden->hidden layers (Linear + ReLU), statically unrolled.
    for i in range(len(mid) // 2):
        w = mid[2 * i][...].astype(f32)
        b = mid[2 * i + 1][...].astype(f32)
        h = jnp.maximum(jnp.dot(h, w, preferred_element_type=f32) + b, 0.0)

    # Final hidden->1 projection, emitted lane-dense:
    #   out[0, t] = sum_k wL[0, k] * h[t, k]    -> shape (1, tm)
    out = lax.dot_general(wl_ref[...].astype(f32), h,
                          (((1,), (1,)), ((), ())),
                          preferred_element_type=f32)
    o_ref[...] = (out + bl_ref[...].astype(f32)).astype(o_ref.dtype)


# ----------------------------- Forward wrapper -------------------------------

def _choose_row_tile(n, max_tile=1024):
    """Row tile: whole (8-rounded) N in one step when small; otherwise >=2
    steps of a 128-multiple tile (v7x dual-TensorCore + lane-dense output)."""
    n8 = _round_up(n, 8)
    if n8 <= 256:
        return n8
    return min(max_tile, _round_up(pl.cdiv(n8, 2), 128))


def hfp_critic_forward(dr_src, real_bv, real_hfp, hfp_feat,
                       transformer_params, critic_weights, critic_biases,
                       *, max_tile=1024):
    """Mirrors HFP_Critic.forward (stand-in transformer + critic MLP)."""
    del dr_src, real_bv  # consumed only by the real transformer sub-module
    wt, bt = transformer_params
    n_batch, n_wave, n_bv_feat = real_hfp.shape
    d_model = wt.shape[1]
    img_dim = hfp_feat.shape[-1]
    hidden = critic_weights[0].shape[1]
    n_layers = len(critic_weights) - 1
    n = n_batch * n_wave

    hfp_flat = real_hfp.reshape(n, n_bv_feat)
    feat_flat = hfp_feat.reshape(n, img_dim)

    tm = _choose_row_tile(n, max_tile)
    n_pad = _round_up(n, tm)
    if n_pad != n:  # pad only when needed (padded rows are sliced off below)
        hfp_flat = jnp.pad(hfp_flat, ((0, n_pad - n), (0, 0)))
        feat_flat = jnp.pad(feat_flat, ((0, n_pad - n), (0, 0)))

    # Split the first-layer weight so concat(est, feat) never hits HBM.
    w0 = critic_weights[0]
    w0a, w0b = w0[:d_model], w0[d_model:]
    wl_row = critic_weights[-1].reshape(1, hidden)   # (hidden, 1) -> (1, hidden)
    bl = critic_biases[-1].reshape(1, 1)

    operands = [hfp_flat, feat_flat, wt, bt.reshape(1, d_model),
                w0a, w0b, critic_biases[0].reshape(1, hidden)]
    in_specs = [
        pl.BlockSpec((tm, n_bv_feat), lambda i: (i, 0)),
        pl.BlockSpec((tm, img_dim), lambda i: (i, 0)),
        pl.BlockSpec(wt.shape, lambda i: (0, 0)),
        pl.BlockSpec((1, d_model), lambda i: (0, 0)),
        pl.BlockSpec(w0a.shape, lambda i: (0, 0)),
        pl.BlockSpec(w0b.shape, lambda i: (0, 0)),
        pl.BlockSpec((1, hidden), lambda i: (0, 0)),
    ]
    for w, b in zip(critic_weights[1:-1], critic_biases[1:-1]):
        operands += [w, b.reshape(1, -1)]
        in_specs += [pl.BlockSpec(w.shape, lambda i: (0, 0)),
                     pl.BlockSpec((1, w.shape[1]), lambda i: (0, 0))]
    operands += [wl_row, bl]
    in_specs += [pl.BlockSpec((1, hidden), lambda i: (0, 0)),
                 pl.BlockSpec((1, 1), lambda i: (0, 0))]

    # Advisory cost estimate for XLA's scheduler around the custom call.
    flops = 2 * n_pad * (n_bv_feat * d_model          # stand-in transformer
                         + (d_model + img_dim) * hidden     # first critic layer
                         + (n_layers - 1) * hidden * hidden  # middle layers
                         + hidden)                          # final projection
    bytes_accessed = (sum(int(x.size) * 4 for x in operands) + 4 * n_pad)
    cost = pl.CostEstimate(flops=flops, transcendentals=n_pad * d_model,
                           bytes_accessed=bytes_accessed)

    out = pl.pallas_call(
        hfp_critic_kernel,
        out_shape=jax.ShapeDtypeStruct((1, n_pad), jnp.float32),
        grid_spec=pltpu.PrefetchScalarGridSpec(
            num_scalar_prefetch=0,
            grid=(n_pad // tm,),
            in_specs=in_specs,
            out_specs=pl.BlockSpec((1, tm), lambda i: (0, i)),  # lane-dense
        ),
        compiler_params=pltpu.CompilerParams(
            dimension_semantics=("parallel",)),
        cost_estimate=cost,
    )(*operands)
    return out[0, :n].reshape(n, 1)


# --------------------------- Pure-JAX reference ------------------------------

def hfp_critic_forward_ref(dr_src, real_bv, real_hfp, hfp_feat,
                           transformer_params, critic_weights, critic_biases):
    del dr_src, real_bv
    wt, bt = transformer_params
    est_hfp = jnp.tanh(jnp.einsum("bwf,fd->bwd", real_hfp, wt) + bt)
    n_batch, n_wave, d_model = est_hfp.shape
    img_dim = hfp_feat.shape[-1]
    h = jnp.concatenate(
        [est_hfp.reshape(n_batch * n_wave, d_model),
         hfp_feat.reshape(n_batch * n_wave, img_dim)], axis=1)
    n_lin = len(critic_weights)
    for i in range(n_lin):
        h = h @ critic_weights[i] + critic_biases[i]
        if i < n_lin - 1:
            h = jnp.maximum(h, 0.0)
    return h


# ------------------------- Parameter construction ----------------------------

def xavier_uniform(key, fan_in, fan_out):
    bound = math.sqrt(6.0 / (fan_in + fan_out))
    return jax.random.uniform(key, (fan_in, fan_out), jnp.float32, -bound, bound)


def make_critic_params(key, cond_dim, hidden_dim, n_layers):
    """Weights (in, out) + biases, matching the torch nn.Sequential layout."""
    dims = [cond_dim] + [hidden_dim] * n_layers + [1]
    weights, biases = [], []
    for i in range(len(dims) - 1):
        key, kw, kb = jax.random.split(key, 3)
        weights.append(xavier_uniform(kw, dims[i], dims[i + 1]))
        bb = 1.0 / math.sqrt(dims[i])  # torch Linear default bias init
        biases.append(jax.random.uniform(kb, (dims[i + 1],), jnp.float32, -bb, bb))
    return weights, biases


def _run_case(key, n_batch, n_wave, n_alt, n_dr_feat, n_bv_feat,
              d_model, img_dim, hidden_dim, n_layers):
    cond_dim = d_model + img_dim
    key, k1, k2, k3, k4, k5, k6, k7 = jax.random.split(key, 8)

    dr_src = jax.random.normal(k1, (n_batch, n_dr_feat), jnp.float32)
    real_bv = jax.random.normal(k2, (n_batch, n_alt, n_bv_feat), jnp.float32)
    real_hfp = jax.random.normal(k3, (n_batch, n_wave, n_bv_feat), jnp.float32)
    hfp_feat = jax.random.normal(k4, (n_batch, n_wave, img_dim), jnp.float32)

    # stand-in transformer parameters (deterministic)
    wt = xavier_uniform(k5, n_bv_feat, d_model)
    bt = jax.random.uniform(k6, (d_model,), jnp.float32, -0.1, 0.1)

    # critic MLP parameters (xavier_uniform_ on dim>1, as in _reset_parameters)
    critic_weights, critic_biases = make_critic_params(
        k7, cond_dim, hidden_dim, n_layers)

    out = hfp_critic_forward(dr_src, real_bv, real_hfp, hfp_feat,
                             (wt, bt), critic_weights, critic_biases)
    out = jax.block_until_ready(out)

    ref = hfp_critic_forward_ref(dr_src, real_bv, real_hfp, hfp_feat,
                                 (wt, bt), critic_weights, critic_biases)
    ref = jax.block_until_ready(ref)

    assert out.shape == (n_batch * n_wave, 1), out.shape
    assert jnp.allclose(out, ref, atol=2e-4, rtol=2e-4), (
        float(jnp.max(jnp.abs(out - ref))))


# ---------------------------------- Main --------------------------------------

if __name__ == "__main__":
    key = jax.random.PRNGKey(0)

    # Small config: single-tile path (whole N in one grid step).
    _run_case(key, n_batch=2, n_wave=8, n_alt=8, n_dr_feat=8, n_bv_feat=4,
              d_model=32, img_dim=16, hidden_dim=128, n_layers=4)

    # Larger N: exercises the multi-tile, 128-multiple lane-dense grid path.
    _run_case(key, n_batch=4, n_wave=100, n_alt=8, n_dr_feat=8, n_bv_feat=4,
              d_model=32, img_dim=16, hidden_dim=128, n_layers=4)

    print("KERNEL_OK")
</pallas_src>

<mosaic_0001>
module attributes {stable_mosaic.version = 11 : i64} {
  func.func @hfp_critic_kernel(%arg0: i32, %arg1: memref<16x4xf32, #tpu.memory_space<vmem>>, %arg2: memref<16x16xf32, #tpu.memory_space<vmem>>, %arg3: memref<4x32xf32, #tpu.memory_space<vmem>>, %arg4: memref<1x32xf32, #tpu.memory_space<vmem>>, %arg5: memref<32x128xf32, #tpu.memory_space<vmem>>, %arg6: memref<16x128xf32, #tpu.memory_space<vmem>>, %arg7: memref<1x128xf32, #tpu.memory_space<vmem>>, %arg8: memref<128x128xf32, #tpu.memory_space<vmem>>, %arg9: memref<1x128xf32, #tpu.memory_space<vmem>>, %arg10: memref<128x128xf32, #tpu.memory_space<vmem>>, %arg11: memref<1x128xf32, #tpu.memory_space<vmem>>, %arg12: memref<128x128xf32, #tpu.memory_space<vmem>>, %arg13: memref<1x128xf32, #tpu.memory_space<vmem>>, %arg14: memref<1x128xf32, #tpu.memory_space<vmem>>, %arg15: memref<1x1xf32, #tpu.memory_space<vmem>>, %arg16: memref<1x16xf32, #tpu.memory_space<vmem>>) attributes {dimension_semantics = [#tpu.dimension_semantics<parallel>], iteration_bounds = array<i64: 1>, scalar_prefetch = 0 : i64, scratch_operands = 0 : i64, tpu.core_type = #tpu.core_type<tc>, window_params = [{transform_indices = @transform_0, window_bounds = array<i64: 16, 4>}, {transform_indices = @transform_1, window_bounds = array<i64: 16, 16>}, {pipeline_mode = #tpu.pipeline_mode<synchronous>, transform_indices = @transform_2, window_bounds = array<i64: 4, 32>}, {pipeline_mode = #tpu.pipeline_mode<synchronous>, transform_indices = @transform_3, window_bounds = array<i64: 1, 32>}, {pipeline_mode = #tpu.pipeline_mode<synchronous>, transform_indices = @transform_4, window_bounds = array<i64: 32, 128>}, {pipeline_mode = #tpu.pipeline_mode<synchronous>, transform_indices = @transform_5, window_bounds = array<i64: 16, 128>}, {pipeline_mode = #tpu.pipeline_mode<synchronous>, transform_indices = @transform_6, window_bounds = array<i64: 1, 128>}, {pipeline_mode = #tpu.pipeline_mode<synchronous>, transform_indices = @transform_7, window_bounds = array<i64: 128, 128>}, {pipeline_mode = #tpu.pipeline_mode<synchronous>, transform_indices = @transform_8, window_bounds = array<i64: 1, 128>}, {pipeline_mode = #tpu.pipeline_mode<synchronous>, transform_indices = @transform_9, window_bounds = array<i64: 128, 128>}, {pipeline_mode = #tpu.pipeline_mode<synchronous>, transform_indices = @transform_10, window_bounds = array<i64: 1, 128>}, {pipeline_mode = #tpu.pipeline_mode<synchronous>, transform_indices = @transform_11, window_bounds = array<i64: 128, 128>}, {pipeline_mode = #tpu.pipeline_mode<synchronous>, transform_indices = @transform_12, window_bounds = array<i64: 1, 128>}, {pipeline_mode = #tpu.pipeline_mode<synchronous>, transform_indices = @transform_13, window_bounds = array<i64: 1, 128>}, {pipeline_mode = #tpu.pipeline_mode<synchronous>, transform_indices = @transform_14, window_bounds = array<i64: 1, 1>}, {transform_indices = @transform_15, window_bounds = array<i64: 1, 16>}]} {
    %c0 = arith.constant 0 : index
    %c0_0 = arith.constant 0 : index
    %0 = vector.load %arg1[%c0, %c0_0] : memref<16x4xf32, #tpu.memory_space<vmem>>, vector<16x4xf32>
    %c0_1 = arith.constant 0 : index
    %c0_2 = arith.constant 0 : index
    %1 = vector.load %arg3[%c0_1, %c0_2] : memref<4x32xf32, #tpu.memory_space<vmem>>, vector<4x32xf32>
    %cst = arith.constant dense<0.000000e+00> : vector<16x32xf32>
    %2 = tpu.matmul %0, %1, %cst {dimension_numbers = #tpu.dot_dimension_numbers<[1], [0], [0], [1], [0, 0, 1, 1], [], []>} : vector<16x4xf32>, vector<4x32xf32>, vector<16x32xf32> -> vector<16x32xf32>
    %c0_3 = arith.constant 0 : index
    %c0_4 = arith.constant 0 : index
    %3 = vector.load %arg4[%c0_3, %c0_4] : memref<1x32xf32, #tpu.memory_space<vmem>>, vector<1x32xf32>
    %4 = vector.broadcast %3 : vector<1x32xf32> to vector<16x32xf32>
    %5 = arith.addf %2, %4 : vector<16x32xf32>
    %6 = math.tanh %5 : vector<16x32xf32>
    %c0_5 = arith.constant 0 : index
    %c0_6 = arith.constant 0 : index
    %7 = vector.load %arg5[%c0_5, %c0_6] : memref<32x128xf32, #tpu.memory_space<vmem>>, vector<32x128xf32>
    %cst_7 = arith.constant dense<0.000000e+00> : vector<16x128xf32>
    %8 = tpu.matmul %6, %7, %cst_7 {dimension_numbers = #tpu.dot_dimension_numbers<[1], [0], [0], [1], [0, 0, 1, 1], [], []>} : vector<16x32xf32>, vector<32x128xf32>, vector<16x128xf32> -> vector<16x128xf32>
    %c0_8 = arith.constant 0 : index
    %c0_9 = arith.constant 0 : index
    %9 = vector.load %arg2[%c0_8, %c0_9] : memref<16x16xf32, #tpu.memory_space<vmem>>, vector<16x16xf32>
    %c0_10 = arith.constant 0 : index
    %c0_11 = arith.constant 0 : index
    %10 = vector.load %arg6[%c0_10, %c0_11] : memref<16x128xf32, #tpu.memory_space<vmem>>, vector<16x128xf32>
    %cst_12 = arith.constant dense<0.000000e+00> : vector<16x128xf32>
    %11 = tpu.matmul %9, %10, %cst_12 {dimension_numbers = #tpu.dot_dimension_numbers<[1], [0], [0], [1], [0, 0, 1, 1], [], []>} : vector<16x16xf32>, vector<16x128xf32>, vector<16x128xf32> -> vector<16x128xf32>
    %12 = arith.addf %8, %11 : vector<16x128xf32>
    %c0_13 = arith.constant 0 : index
    %c0_14 = arith.constant 0 : index
    %13 = vector.load %arg7[%c0_13, %c0_14] : memref<1x128xf32, #tpu.memory_space<vmem>>, vector<1x128xf32>
    %14 = vector.broadcast %13 : vector<1x128xf32> to vector<16x128xf32>
    %15 = arith.addf %12, %14 : vector<16x128xf32>
    %cst_15 = arith.constant 0.000000e+00 : f32
    %16 = vector.broadcast %cst_15 : f32 to vector<16x128xf32>
    %17 = arith.maximumf %15, %16 : vector<16x128xf32>
    %c0_16 = arith.constant 0 : index
    %c0_17 = arith.constant 0 : index
    %18 = vector.load %arg8[%c0_16, %c0_17] : memref<128x128xf32, #tpu.memory_space<vmem>>, vector<128x128xf32>
    %c0_18 = arith.constant 0 : index
    %c0_19 = arith.constant 0 : index
    %19 = vector.load %arg9[%c0_18, %c0_19] : memref<1x128xf32, #tpu.memory_space<vmem>>, vector<1x128xf32>
    %cst_20 = arith.constant dense<0.000000e+00> : vector<16x128xf32>
    %20 = tpu.matmul %17, %18, %cst_20 {dimension_numbers = #tpu.dot_dimension_numbers<[1], [0], [0], [1], [0, 0, 1, 1], [], []>} : vector<16x128xf32>, vector<128x128xf32>, vector<16x128xf32> -> vector<16x128xf32>
    %21 = vector.broadcast %19 : vector<1x128xf32> to vector<16x128xf32>
    %22 = arith.addf %20, %21 : vector<16x128xf32>
    %cst_21 = arith.constant 0.000000e+00 : f32
    %23 = vector.broadcast %cst_21 : f32 to vector<16x128xf32>
    %24 = arith.maximumf %22, %23 : vector<16x128xf32>
    %c0_22 = arith.constant 0 : index
    %c0_23 = arith.constant 0 : index
    %25 = vector.load %arg10[%c0_22, %c0_23] : memref<128x128xf32, #tpu.memory_space<vmem>>, vector<128x128xf32>
    %c0_24 = arith.constant 0 : index
    %c0_25 = arith.constant 0 : index
    %26 = vector.load %arg11[%c0_24, %c0_25] : memref<1x128xf32, #tpu.memory_space<vmem>>, vector<1x128xf32>
    %cst_26 = arith.constant dense<0.000000e+00> : vector<16x128xf32>
    %27 = tpu.matmul %24, %25, %cst_26 {dimension_numbers = #tpu.dot_dimension_numbers<[1], [0], [0], [1], [0, 0, 1, 1], [], []>} : vector<16x128xf32>, vector<128x128xf32>, vector<16x128xf32> -> vector<16x128xf32>
    %28 = vector.broadcast %26 : vector<1x128xf32> to vector<16x128xf32>
    %29 = arith.addf %27, %28 : vector<16x128xf32>
    %cst_27 = arith.constant 0.000000e+00 : f32
    %30 = vector.broadcast %cst_27 : f32 to vector<16x128xf32>
    %31 = arith.maximumf %29, %30 : vector<16x128xf32>
    %c0_28 = arith.constant 0 : index
    %c0_29 = arith.constant 0 : index
    %32 = vector.load %arg12[%c0_28, %c0_29] : memref<128x128xf32, #tpu.memory_space<vmem>>, vector<128x128xf32>
    %c0_30 = arith.constant 0 : index
    %c0_31 = arith.constant 0 : index
    %33 = vector.load %arg13[%c0_30, %c0_31] : memref<1x128xf32, #tpu.memory_space<vmem>>, vector<1x128xf32>
    %cst_32 = arith.constant dense<0.000000e+00> : vector<16x128xf32>
    %34 = tpu.matmul %31, %32, %cst_32 {dimension_numbers = #tpu.dot_dimension_numbers<[1], [0], [0], [1], [0, 0, 1, 1], [], []>} : vector<16x128xf32>, vector<128x128xf32>, vector<16x128xf32> -> vector<16x128xf32>
    %35 = vector.broadcast %33 : vector<1x128xf32> to vector<16x128xf32>
    %36 = arith.addf %34, %35 : vector<16x128xf32>
    %cst_33 = arith.constant 0.000000e+00 : f32
    %37 = vector.broadcast %cst_33 : f32 to vector<16x128xf32>
    %38 = arith.maximumf %36, %37 : vector<16x128xf32>
    %c0_34 = arith.constant 0 : index
    %c0_35 = arith.constant 0 : index
    %39 = vector.load %arg14[%c0_34, %c0_35] : memref<1x128xf32, #tpu.memory_space<vmem>>, vector<1x128xf32>
    %cst_36 = arith.constant dense<0.000000e+00> : vector<1x16xf32>
    %40 = tpu.matmul %39, %38, %cst_36 {dimension_numbers = #tpu.dot_dimension_numbers<[1], [1], [0], [0], [0, 0, 1, 0], [], []>} : vector<1x128xf32>, vector<16x128xf32>, vector<1x16xf32> -> vector<1x16xf32>
    %c0_37 = arith.constant 0 : index
    %c0_38 = arith.constant 0 : index
    %41 = vector.load %arg15[%c0_37, %c0_38] : memref<1x1xf32, #tpu.memory_space<vmem>>, vector<1x1xf32>
    %42 = vector.broadcast %41 : vector<1x1xf32> to vector<1x16xf32>
    %43 = arith.addf %40, %42 : vector<1x16xf32>
    %c0_39 = arith.constant 0 : index
    %c0_40 = arith.constant 0 : index
    %44 = vector.load %arg16[%c0_39, %c0_40] : memref<1x16xf32, #tpu.memory_space<vmem>>, vector<1x16xf32>
    tpu.vector_store %arg16[%c0_39, %c0_40], %43 {strides = array<i32>} : memref<1x16xf32, #tpu.memory_space<vmem>>, vector<1x16xf32>,
    return
  }
  func.func @transform_0(%arg0: i32) -> (i32, i32) {
    %c0_i32 = arith.constant 0 : i32
    %c0_i32_0 = arith.constant 0 : i32
    return %arg0, %c0_i32 : i32, i32
  }
  func.func @transform_1(%arg0: i32) -> (i32, i32) {
    %c0_i32 = arith.constant 0 : i32
    %c0_i32_0 = arith.constant 0 : i32
    return %arg0, %c0_i32 : i32, i32
  }
  func.func @transform_2(%arg0: i32) -> (i32, i32) {
    %c0_i32 = arith.constant 0 : i32
    %c0_i32_0 = arith.constant 0 : i32
    %c0_i32_1 = arith.constant 0 : i32
    return %c0_i32, %c0_i32_0 : i32, i32
  }
  func.func @transform_3(%arg0: i32) -> (i32, i32) {
    %c0_i32 = arith.constant 0 : i32
    %c0_i32_0 = arith.constant 0 : i32
    %c0_i32_1 = arith.constant 0 : i32
    return %c0_i32, %c0_i32_0 : i32, i32
  }
  func.func @transform_4(%arg0: i32) -> (i32, i32) {
    %c0_i32 = arith.constant 0 : i32
    %c0_i32_0 = arith.constant 0 : i32
    %c0_i32_1 = arith.constant 0 : i32
    return %c0_i32, %c0_i32_0 : i32, i32
  }
  func.func @transform_5(%arg0: i32) -> (i32, i32) {
    %c0_i32 = arith.constant 0 : i32
    %c0_i32_0 = arith.constant 0 : i32
    %c0_i32_1 = arith.constant 0 : i32
    return %c0_i32, %c0_i32_0 : i32, i32
  }
  func.func @transform_6(%arg0: i32) -> (i32, i32) {
    %c0_i32 = arith.constant 0 : i32
    %c0_i32_0 = arith.constant 0 : i32
    %c0_i32_1 = arith.constant 0 : i32
    return %c0_i32, %c0_i32_0 : i32, i32
  }
  func.func @transform_7(%arg0: i32) -> (i32, i32) {
    %c0_i32 = arith.constant 0 : i32
    %c0_i32_0 = arith.constant 0 : i32
    %c0_i32_1 = arith.constant 0 : i32
    return %c0_i32, %c0_i32_0 : i32, i32
  }
  func.func @transform_8(%arg0: i32) -> (i32, i32) {
    %c0_i32 = arith.constant 0 : i32
    %c0_i32_0 = arith.constant 0 : i32
    %c0_i32_1 = arith.constant 0 : i32
    return %c0_i32, %c0_i32_0 : i32, i32
  }
  func.func @transform_9(%arg0: i32) -> (i32, i32) {
    %c0_i32 = arith.constant 0 : i32
    %c0_i32_0 = arith.constant 0 : i32
    %c0_i32_1 = arith.constant 0 : i32
    return %c0_i32, %c0_i32_0 : i32, i32
  }
  func.func @transform_10(%arg0: i32) -> (i32, i32) {
    %c0_i32 = arith.constant 0 : i32
    %c0_i32_0 = arith.constant 0 : i32
    %c0_i32_1 = arith.constant 0 : i32
    return %c0_i32, %c0_i32_0 : i32, i32
  }
  func.func @transform_11(%arg0: i32) -> (i32, i32) {
    %c0_i32 = arith.constant 0 : i32
    %c0_i32_0 = arith.constant 0 : i32
    %c0_i32_1 = arith.constant 0 : i32
    return %c0_i32, %c0_i32_0 : i32, i32
  }
  func.func @transform_12(%arg0: i32) -> (i32, i32) {
    %c0_i32 = arith.constant 0 : i32
    %c0_i32_0 = arith.constant 0 : i32
    %c0_i32_1 = arith.constant 0 : i32
    return %c0_i32, %c0_i32_0 : i32, i32
  }
  func.func @transform_13(%arg0: i32) -> (i32, i32) {
    %c0_i32 = arith.constant 0 : i32
    %c0_i32_0 = arith.constant 0 : i32
    %c0_i32_1 = arith.constant 0 : i32
    return %c0_i32, %c0_i32_0 : i32, i32
  }
  func.func @transform_14(%arg0: i32) -> (i32, i32) {
    %c0_i32 = arith.constant 0 : i32
    %c0_i32_0 = arith.constant 0 : i32
    %c0_i32_1 = arith.constant 0 : i32
    return %c0_i32, %c0_i32_0 : i32, i32
  }
  func.func @transform_15(%arg0: i32) -> (i32, i32) {
    %c0_i32 = arith.constant 0 : i32
    %c0_i32_0 = arith.constant 0 : i32
    return %c0_i32, %arg0 : i32, i32
  }
}

</mosaic_0001>

<bundles_post_ra>
// kernel: tpu_custom_call.1
= control target key start
LH: loop header
LB: loop body
LE: loop exit
PB: predicated region body
PF: predicated region fallthrough
CT: control target
= control target key end

     0   :  { %s1524_s0 = inlined_call_operand.vmem [shape: f32[16,4], index: 0, kind: input, shape index: {}]   ;;  %s1525_s1 = inlined_call_operand.hbm [shape: f32[16,16], index: 1, kind: input, shape index: {}]   ;;  %s1526_s2 = inlined_call_operand.vmem [shape: f32[4,32], index: 2, kind: input, shape index: {}]   ;;  %s1527_s3 = inlined_call_operand.vmem [shape: f32[1,32], index: 3, kind: input, shape index: {}]   ;;  %s1528_s4 = inlined_call_operand.vmem [shape: f32[32,128], index: 4, kind: input, shape index: {}]   ;;  %s1529_s5 = inlined_call_operand.hbm [shape: f32[16,128], index: 5, kind: input, shape index: {}]   ;;  %s1530_s6 = inlined_call_operand.vmem [shape: f32[1,128], index: 6, kind: input, shape index: {}]   ;;  %s1531_s7 = inlined_call_operand.hbm [shape: f32[128,128], index: 7, kind: input, shape index: {}]   ;;  %s1532_s8 = inlined_call_operand.vmem [shape: f32[1,128], index: 8, kind: input, shape index: {}]   ;;  %s1533_s9 = inlined_call_operand.hbm [shape: f32[128,128], index: 9, kind: input, shape index: {}]   ;;  %s1534_s10 = inlined_call_operand.vmem [shape: f32[1,128], index: 10, kind: input, shape index: {}]   ;;  %s1535_s11 = inlined_call_operand.hbm [shape: f32[128,128], index: 11, kind: input, shape index: {}]   ;;  %s1536_s12 = inlined_call_operand.vmem [shape: f32[1,128], index: 12, kind: input, shape index: {}]   ;;  %s1537_s13 = inlined_call_operand.vmem [shape: f32[1,128], index: 13, kind: input, shape index: {}]   ;;  %s1538_s14 = inlined_call_operand.<no memory space> [shape: f32[1,1], index: 14, kind: input, shape index: {}]   ;;  %s1539_s15 = inlined_call_operand.hbm [shape: f32[1,16], index: 15, kind: output, shape index: {}]  }
   0x1   :  { %v20_v0 = vstv %s1538_s14 }
   0x2   :  { %21 = vst [vmem:[#allocation2] sm:$0x1] %v20_v0 }
   0x3   :  { %22 = vsyncpa [#allocation4], 0 }
   0x4   :  { %23 = vsyncpa [#allocation7], 0 }
   0x5   :  { %24 = vsyncpa [#allocation10], 0 }
   0x6   :  { %25 = vsyncpa [#allocation5], 0  ;;  %s1289_s20 = smov [#allocation6]   ;;  %s1290_s22 = smov [#allocation9]  }
   0x7   :  { %s51_s21 = sshll.u32 %s1289_s20, 4  ;;  %s79_s23 = sshll.u32 %s1290_s22, 4  ;;  %s52_s21 = int_to_ptr.vmem [resolvable:$true] %s51_s21  ;;  %s1384_s23 = int_to_ptr.vmem [resolvable:$true] %s79_s23 }
   0x8   :  { %s1149_s26 = scalar_lea.hbm %s1529_s5, 256 }
   0x9   :  { %p1150_p0 = scmp.ne.s32.totalorder %s1529_s5, %s1149_s26  ;;  %p1153_p1 = scmp.lt.u32.totalorder %s1149_s26, %s1529_s5 }
   0xb   :  { %p1155_p2 = pnand %p1153_p1, %p1150_p0 }
   0xd   :  { %1158 = shalt.err (!%p1155_p2)
}
   0xe   :  { %s1159_s30 = scalar_lea.vmem %s52_s21, 256  ;;  %p1164_p4 = scmp.lt.s32.totalorder %s52_s21, %s52_s21 }
   0xf   :  { %p1160_p3 = scmp.ne.s32.totalorder %s52_s21, %s1159_s30  ;;  %p1165_p5 = scmp.lt.s32.totalorder %s1159_s30, %s1159_s30 }
  0x11   :  { %p1166_p6 = por %p1165_p5, %p1164_p4 }
  0x13   :  { %p1167_p7 = pnand %p1166_p6, %p1160_p3 }
  0x15   :  { %1170 = shalt.err (!%p1167_p7)
}
  0x16   :  { %s1291_s16 = smov 128   ;;  %s1292_s17 = smov 8  }
  0x17   :  { %57 = dma.hbm_to_vmem [thread:$0]  %s1529_s5, 256, %s52_s21, [#allocation7], %s1291_s16, %s1291_s16, %s1292_s17  }
  0x18   :  { %s1171_s24 = scalar_lea.hbm %s1533_s9, 2048 }
  0x19   :  { %p1172_p8 = scmp.ne.s32.totalorder %s1533_s9, %s1171_s24  ;;  %p1175_p9 = scmp.lt.u32.totalorder %s1171_s24, %s1533_s9 }
  0x1b   :  { %p1177_p10 = pnand %p1175_p9, %p1172_p8 }
  0x1d   :  { %1180 = shalt.err (!%p1177_p10)
}
  0x1e   :  { %s1181_s14 = scalar_lea.vmem %s1384_s23, 2048  ;;  %p1186_p12 = scmp.lt.s32.totalorder %s1384_s23, %s1384_s23 }
  0x1f   :  { %p1182_p11 = scmp.ne.s32.totalorder %s1384_s23, %s1181_s14  ;;  %p1187_p13 = scmp.lt.s32.totalorder %s1181_s14, %s1181_s14 }
  0x21   :  { %p1188_p0 = por %p1187_p13, %p1186_p12 }
  0x23   :  { %p1189_p1 = pnand %p1188_p0, %p1182_p11 }
  0x25   :  { %1192 = shalt.err (!%p1189_p1)
}
  0x26   :  { %85 = dma.hbm_to_vmem [thread:$0]  %s1533_s9, 2048, %s1384_s23, [#allocation10], %s1291_s16, %s1291_s16, %s1292_s17  }
  0x27   :  { %s1293_s29 = smov [#allocation3]   ;;  %s1294_s18 = smov [#allocation8]  }
  0x28   :  { %s33_s30 = sshll.u32 %s1293_s29, 4  ;;  %s65_s19 = sshll.u32 %s1294_s18, 4  ;;  %s34_s30 = int_to_ptr.vmem [resolvable:$true] %s33_s30  ;;  %s1421_s19 = int_to_ptr.vmem [resolvable:$true] %s65_s19 }
  0x29   :  { %s1193_s24 = scalar_lea.hbm %s1525_s1, 256 }
  0x2a   :  { %p1194_p2 = scmp.ne.s32.totalorder %s1525_s1, %s1193_s24  ;;  %p1197_p3 = scmp.lt.u32.totalorder %s1193_s24, %s1525_s1 }
  0x2c   :  { %p1199_p4 = pnand %p1197_p3, %p1194_p2 }
  0x2e   :  { %1202 = shalt.err (!%p1199_p4)
}
  0x2f   :  { %s1203_s9 = scalar_lea.vmem %s34_s30, 256  ;;  %p1208_p6 = scmp.lt.s32.totalorder %s34_s30, %s34_s30 }
  0x30   :  { %p1204_p5 = scmp.ne.s32.totalorder %s34_s30, %s1203_s9  ;;  %p1209_p7 = scmp.lt.s32.totalorder %s1203_s9, %s1203_s9 }
  0x32   :  { %p1210_p8 = por %p1209_p7, %p1208_p6 }
  0x34   :  { %p1211_p9 = pnand %p1210_p8, %p1204_p5 }
  0x36   :  { %1214 = shalt.err (!%p1211_p9)
}
  0x37   :  { %39 = dma.hbm_to_vmem [thread:$0]  %s1525_s1, 256, %s34_s30, [#allocation4], %s1291_s16, %s1291_s16, %s1292_s17  }
  0x38   :  { %s1215_s29 = scalar_lea.hbm %s1531_s7, 2048 }
  0x39   :  { %p1216_p10 = scmp.ne.s32.totalorder %s1531_s7, %s1215_s29  ;;  %p1219_p11 = scmp.lt.u32.totalorder %s1215_s29, %s1531_s7 }
  0x3b   :  { %p1221_p12 = pnand %p1219_p11, %p1216_p10 }
  0x3d   :  { %1224 = shalt.err (!%p1221_p12)
}
  0x3e   :  { %s1225_s25 = scalar_lea.vmem %s1421_s19, 2048  ;;  %p1230_p0 = scmp.lt.s32.totalorder %s1421_s19, %s1421_s19 }
  0x3f   :  { %p1226_p13 = scmp.ne.s32.totalorder %s1421_s19, %s1225_s25  ;;  %p1231_p1 = scmp.lt.s32.totalorder %s1225_s25, %s1225_s25 }
  0x41   :  { %p1232_p2 = por %p1231_p1, %p1230_p0 }
  0x43   :  { %p1233_p3 = pnand %p1232_p2, %p1226_p13 }
  0x45   :  { %1236 = shalt.err (!%p1233_p3)
}
  0x46   :  { %71 = dma.hbm_to_vmem [thread:$0]  %s1531_s7, 2048, %s1421_s19, [#allocation7], %s1291_s16, %s1291_s16, %s1292_s17  }
  0x47   :  { %s1295_s26 = smov [#allocation11]   ;;  %s1237_s23 = scalar_lea.hbm %s1535_s11, 2048 }
  0x48   :  { %s93_s27 = sshll.u32 %s1295_s26, 4  ;;  %p1238_p4 = scmp.ne.s32.totalorder %s1535_s11, %s1237_s23  ;;  %s94_s27 = int_to_ptr.vmem [resolvable:$true] %s93_s27 }
  0x49   :  { %p1241_p5 = scmp.lt.u32.totalorder %s1237_s23, %s1535_s11 }
  0x4b   :  { %p1243_p6 = pnand %p1241_p5, %p1238_p4 }
  0x4d   :  { %1246 = shalt.err (!%p1243_p6)
}
  0x4e   :  { %s1247_s18 = scalar_lea.vmem %s94_s27, 2048  ;;  %p1252_p8 = scmp.lt.s32.totalorder %s94_s27, %s94_s27 }
  0x4f   :  { %p1248_p7 = scmp.ne.s32.totalorder %s94_s27, %s1247_s18  ;;  %p1253_p9 = scmp.lt.s32.totalorder %s1247_s18, %s1247_s18 }
  0x51   :  { %p1254_p10 = por %p1253_p9, %p1252_p8 }
  0x53   :  { %p1255_p11 = pnand %p1254_p10, %p1248_p7 }
  0x55   :  { %1258 = shalt.err (!%p1255_p11)
}
  0x56   :  { %99 = dma.hbm_to_vmem [thread:$0]  %s1535_s11, 2048, %s94_s27, [#allocation10], %s1291_s16, %s1291_s16, %s1292_s17  }
  0x57   :  { %1281 = dma.done.wait [#allocation4], 256  }
  0x58   :  { %1282 = vsyncadd [#allocation4], 4294967040 }
  0x59   :  { %1283 = dma.done.wait [#allocation7], 2304  }
  0x5a   :  { %1284 = vsyncadd [#allocation7], 4294964992 }
  0x5b   :  { %1285 = dma.done.wait [#allocation10], 4096  }
  0x5c   :  { %1286 = vsyncadd [#allocation10], 4294963200  ;;  %vm138_vm0 = vcmask 1043456   ;;  %vm131_vm1 = vcmask 31744   ;;  %v123_v1 = vld [vmem:[%s1526_s2] sm:$0xf] }
  0x5d   :  { %v121_v2 = vld [vmem:[%s1524_s0] sm:$0xff]  ;;  %v122_v3 = vld [vmem:[%s1524_s0 + $0x8] sm:$0xff]  ;;  %884 = vmatprep.subr.msk.mxu1 %vm138_vm0, %v123_v1  ;;  %v225_v4 = vld [vmem:[#allocation6] sm:$0xff]  ;;  %vm227_vm2 = vcmask 130048   ;;  %vm309_vm3 = vcmask 261120   ;;  %vm1297_vm4 = vmmov 0  }
  0x5e   :  { %886 = vmatprep.mubr.msk.f32.mxu1 %vm131_vm1, %v121_v2  ;;  %885 = vmatpush3.msk.msra.mxu1 %vm138_vm0, %v123_v1  ;;  %v226_v5 = vld [vmem:[#allocation6 + $0x8] sm:$0xff]  ;;  %v223_v7 = vld [vmem:[#allocation3] sm:$0xff]  ;;  %v224_v11 = vld [vmem:[#allocation3 + $0x8] sm:$0xff]  ;;  %s1300_s7 = smov [#allocation12]   ;;  %vm783_vm5 = vcmask 122880  }
  0x5f   :  { %887 = vmatmul.mubr.msk.f32.vlgmr.msra.gmra.mrb[0].mxu1 %vm131_vm1, %v122_v3  ;;  %v1019_v6 = vpack.c.bf16 %v226_v5, %v225_v4  ;;  %v219_v8 = vld [vmem:[%s1528_s4] sm:$0xff]  ;;  %v220_v9 = vld [vmem:[%s1528_s4 + $0x8] sm:$0xff]  ;;  %v221_v12 = vld [vmem:[%s1528_s4 + $0x10] sm:$0xff] }
  0x60   :  { %893 = vmatprep.mubr.msk.f32.mxu1 %vm227_vm2, %v223_v7  ;;  %v1023_v10 = vpack.c.bf16 %v220_v9, %v219_v8  ;;  %v222_v13 = vld [vmem:[%s1528_s4 + $0x18] sm:$0xff]  ;;  %v402_v15 = vld [vmem:[#allocation8] sm:$0xff]  ;;  %v403_v16 = vld [vmem:[#allocation8 + $0x8] sm:$0xff] }
  0x61   :  { %1020 = vmatprep.subr.bf16.mxu1 %v1019_v6  ;;  %v1027_v14 = vpack.c.bf16 %v222_v13, %v221_v12  ;;  %v404_v17 = vld [vmem:[#allocation8 + $0x10] sm:$0xff]  ;;  %v1031_v18 = vpack.c.bf16 %v403_v16, %v402_v15  ;;  %v405_v19 = vld [vmem:[#allocation8 + $0x18] sm:$0xff]  ;;  %v406_v21 = vld [vmem:[#allocation8 + $0x20] sm:$0xff] }
  0x62   :  { %1022 = vmatpush3.bf16.msra.mxu1 %v1019_v6  ;;  %v1035_v20 = vpack.c.bf16 %v405_v19, %v404_v17  ;;  %v407_v22 = vld [vmem:[#allocation8 + $0x28] sm:$0xff]  ;;  %v408_v24 = vld [vmem:[#allocation8 + $0x30] sm:$0xff]  ;;  %v409_v25 = vld [vmem:[#allocation8 + $0x38] sm:$0xff] }
  0x63   :  { %1024 = vmatprep.subr.bf16.mxu1 %v1023_v10  ;;  %1032 = vmatprep.subr.bf16.mxu0 %v1031_v18  ;;  %v1039_v23 = vpack.c.bf16 %v407_v22, %v406_v21  ;;  %v1043_v26 = vpack.c.bf16 %v409_v25, %v408_v24  ;;  %v410_v27 = vld [vmem:[#allocation8 + $0x40] sm:$0xff]  ;;  %v411_v28 = vld [vmem:[#allocation8 + $0x48] sm:$0xff]  ;;  %v412_v30 = vld [vmem:[#allocation8 + $0x50] sm:$0xff] }
  0x64   :  { %1034 = vmatpush3.bf16.msra.mxu0 %v1031_v18  ;;  %v1047_v29 = vpack.c.bf16 %v411_v28, %v410_v27  ;;  %v413_v31 = vld [vmem:[#allocation8 + $0x58] sm:$0xff]  ;;  %v414_v33 = vld [vmem:[#allocation8 + $0x60] sm:$0xff]  ;;  %v415_v34 = vld [vmem:[#allocation8 + $0x68] sm:$0xff] }
  0x65   :  { %894 = vmatmul.mubr.msk.f32.vlgmr.msra.gmra.mrb[2].mxu1 %vm227_vm2, %v224_v11  ;;  %1036 = vmatprep.subr.bf16.mxu0 %v1035_v20  ;;  %v1051_v32 = vpack.c.bf16 %v413_v31, %v412_v30  ;;  %v1055_v35 = vpack.c.bf16 %v415_v34, %v414_v33  ;;  %v802_v36 = vld [vmem:[%s1527_s3] ss:$0 sm:$0xff]  ;;  %v416_v43 = vld [vmem:[#allocation8 + $0x70] sm:$0xff]  ;;  %v502_v46 = vld [vmem:[#allocation9] sm:$0xff] }
  0x66   :  { %1026 = vmatpush3.bf16.msra.mxu1 %v1023_v10  ;;  %v417_v44 = vld [vmem:[#allocation8 + $0x78] sm:$0xff]  ;;  %v503_v47 = vld [vmem:[#allocation9 + $0x8] sm:$0xff]  ;;  %v504_v48 = vld [vmem:[#allocation9 + $0x10] sm:$0xff] }
  0x67   :  { %1028 = vmatprep.subr.bf16.mxu1 %v1027_v14  ;;  %v1059_v45 = vpack.c.bf16 %v417_v44, %v416_v43  ;;  %v1063_v49 = vpack.c.bf16 %v503_v47, %v502_v46  ;;  %v505_v50 = vld [vmem:[#allocation9 + $0x18] sm:$0xff]  ;;  %v506_v52 = vld [vmem:[#allocation9 + $0x20] sm:$0xff]  ;;  %v507_v53 = vld [vmem:[#allocation9 + $0x28] sm:$0xff] }
  0x68   :  { %1038 = vmatpush3.bf16.msra.mxu0 %v1035_v20  ;;  %v1067_v51 = vpack.c.bf16 %v505_v50, %v504_v48  ;;  %v1071_v54 = vpack.c.bf16 %v507_v53, %v506_v52  ;;  %v508_v55 = vld [vmem:[#allocation9 + $0x30] sm:$0xff]  ;;  %v509_v56 = vld [vmem:[#allocation9 + $0x38] sm:$0xff]  ;;  %v510_v58 = vld [vmem:[#allocation9 + $0x40] sm:$0xff]  ;;  %v1298_v52 = vmov 0.0  }
  0x69   :  { %1040 = vmatprep.subr.bf16.mxu0 %v1039_v23  ;;  %v1075_v57 = vpack.c.bf16 %v509_v56, %v508_v55  ;;  %v511_v59 = vld [vmem:[#allocation9 + $0x48] sm:$0xff]  ;;  %v512_v61 = vld [vmem:[#allocation9 + $0x50] sm:$0xff]  ;;  %v513_v62 = vld [vmem:[#allocation9 + $0x58] sm:$0xff] }
  0x6a   :  { %1030 = vmatpush3.bf16.msra.mxu1 %v1027_v14  ;;  %v1079_v60 = vpack.c.bf16 %v511_v59, %v510_v58  ;;  %v1083_v63 = vpack.c.bf16 %v513_v62, %v512_v61  ;;  %v514_v0 = vld [vmem:[#allocation9 + $0x60] sm:$0xff]  ;;  %v515_v1 = vld [vmem:[#allocation9 + $0x68] sm:$0xff]  ;;  %v810_v3 = vld [vmem:[%s1530_s6] ss:$0 sm:$0xff] }
  0x6b   :  { %1064 = vmatprep.subr.bf16.mxu1 %v1063_v49  ;;  %v1087_v2 = vpack.c.bf16 %v515_v1, %v514_v0  ;;  %v516_v10 = vld [vmem:[#allocation9 + $0x70] sm:$0xff]  ;;  %v517_v11 = vld [vmem:[#allocation9 + $0x78] sm:$0xff]  ;;  %v602_v13 = vld [vmem:[#allocation11] sm:$0xff]  ;;  %v709_v0 = vlaneseq }
  0x6c   :  { %1042 = vmatpush3.bf16.msra.mxu0 %v1039_v23  ;;  %v1091_v12 = vpack.c.bf16 %v517_v11, %v516_v10  ;;  %v603_v14 = vld [vmem:[#allocation11 + $0x8] sm:$0xff]  ;;  %v604_v15 = vld [vmem:[#allocation11 + $0x10] sm:$0xff]  ;;  %v605_v17 = vld [vmem:[#allocation11 + $0x18] sm:$0xff] }
  0x6d   :  { %1044 = vmatprep.subr.bf16.mxu0 %v1043_v26  ;;  %v1095_v16 = vpack.c.bf16 %v603_v14, %v602_v13  ;;  %v1099_v18 = vpack.c.bf16 %v605_v17, %v604_v15  ;;  %v606_v19 = vld [vmem:[#allocation11 + $0x20] sm:$0xff]  ;;  %v607_v20 = vld [vmem:[#allocation11 + $0x28] sm:$0xff]  ;;  %v608_v22 = vld [vmem:[#allocation11 + $0x30] sm:$0xff]  ;;  %v710_v1 = vshrl.u32 %v709_v0, 7 }
  0x6e   :  { %v1103_v21 = vpack.c.bf16 %v607_v20, %v606_v19  ;;  %v609_v23 = vld [vmem:[#allocation11 + $0x38] sm:$0xff]  ;;  %v610_v25 = vld [vmem:[#allocation11 + $0x40] sm:$0xff]  ;;  %v612_v28 = vld [vmem:[#allocation11 + $0x50] sm:$0xff] }
  0x6f   :  { %v1107_v24 = vpack.c.bf16 %v609_v23, %v608_v22  ;;  %v614_v31 = vld [vmem:[#allocation11 + $0x60] sm:$0xff]  ;;  %v811_v34 = vld [vmem:[%s1532_s8] ss:$0 sm:$0xff] }
  0x70   :  { %1046 = vmatpush3.bf16.msra.mxu0 %v1043_v26  ;;  %v611_v26 = vld [vmem:[#allocation11 + $0x48] sm:$0xff]  ;;  %v812_v44 = vld [vmem:[%s1534_s10] ss:$0 sm:$0xff] }
  0x71   :  { %1048 = vmatprep.subr.bf16.mxu0 %v1047_v29  ;;  %v1111_v27 = vpack.c.bf16 %v611_v26, %v610_v25  ;;  %v703_v53 = vld [vmem:[#allocation2] sm:$0x1] }
  0x72   :  { %v813_v55 = vld [vmem:[%s1536_s12] ss:$0 sm:$0xff]  ;;  %s791_s12 = sshll.u32 %s1300_s7, 4  ;;  %s792_s12 = int_to_ptr.vmem [resolvable:$true] %s791_s12 }
  0x73   :  { %s1259_s19 = scalar_lea.vmem %s792_s12, 16  ;;  %s1263_s20 = scalar_lea.vmem %s792_s12, 32 }
  0x74   :  { %1050 = vmatpush3.bf16.msra.mxu0 %v1047_v29  ;;  %v613_v29 = vld [vmem:[#allocation11 + $0x58] sm:$0xff]  ;;  %p1260_p12 = scmp.ne.s32.totalorder %s792_s12, %s1259_s19  ;;  %p1264_p13 = scmp.lt.s32.totalorder %s792_s12, %s792_s12 }
  0x75   :  { %1052 = vmatprep.subr.bf16.mxu0 %v1051_v32  ;;  %v1115_v30 = vpack.c.bf16 %v613_v29, %v612_v28  ;;  %p1265_p0 = scmp.lt.s32.totalorder %s1263_s20, %s1259_s19 }
  0x77   :  { %p1266_p1 = por %p1265_p0, %p1264_p13 }
  0x78   :  { %1054 = vmatpush3.bf16.msra.mxu0 %v1051_v32  ;;  %v615_v32 = vld [vmem:[#allocation11 + $0x68] sm:$0xff] }
  0x79   :  { %1056 = vmatprep.subr.bf16.mxu0 %v1055_v35  ;;  %v1119_v33 = vpack.c.bf16 %v615_v32, %v614_v31  ;;  %p1267_p2 = pnand %p1266_p1, %p1260_p12 }
  0x7c   :  { %1058 = vmatpush3.bf16.msra.mxu0 %v1055_v35 }
  0x7d   :  { %1060 = vmatprep.subr.bf16.mxu0 %v1059_v45 }
  0x80   :  { %1062 = vmatpush3.bf16.msra.mxu0 %v1059_v45 }
  0x81   :  { %1096 = vmatprep.subr.bf16.mxu0 %v1095_v16 }
 0x132   :  { %v888_v37 = vpop.f32.mrb[0].mxu1 }
 0x133   :  { %v214_v38 = vadd.f32 %v888_v37, %v802_v36  ;;  %v208_v39 = vpop.f32.mrb[1].mxu1 }
 0x134   :  { %v209_v40 = vadd.f32 %v802_v36, %v208_v39 }
 0x136   :  { %1145 = vtanh.f32 %v209_v40 }
 0x137   :  { %1147 = vtanh.f32 %v214_v38 }
 0x140   :  { %v1146_v41 = vpop.eup %1145 }
 0x141   :  { %v1148_v42 = vpop.eup %1147  ;;  %904 = vmatprep.mubr.msk.f32.mxu1 %vm309_vm3, %v1146_v41  ;;  %v616_v41 = vld [vmem:[#allocation11 + $0x70] sm:$0xff] }
 0x142   :  { %905 = vmatmul.mubr.msk.f32.vlgmr.msra.gmra.mrb[2].mxu1 %vm309_vm3, %v1148_v42  ;;  %v617_v42 = vld [vmem:[#allocation11 + $0x78] sm:$0xff] }
 0x143   :  { %1066 = vmatpush3.bf16.msra.mxu1 %v1063_v49  ;;  %v1123_v43 = vpack.c.bf16 %v617_v42, %v616_v41 }
 0x144   :  { %1068 = vmatprep.subr.bf16.mxu1 %v1067_v51 }
 0x147   :  { %1070 = vmatpush3.bf16.msra.mxu1 %v1067_v51  ;;  %v1296_v51 = vmov 0.0|0.0  }
 0x148   :  { %1072 = vmatprep.subr.bf16.mxu1 %v1071_v54 }
 0x14b   :  { %1074 = vmatpush3.bf16.msra.mxu1 %v1071_v54  ;;  %v1299_v54 = vmov 0  }
 0x14c   :  { %1076 = vmatprep.subr.bf16.mxu1 %v1075_v57  ;;  %1144 = vset.pattern.permute.xlu0 %v1299_v54 }
 0x14d   :  { %706 = vperm.xlu0 %1144, %v703_v53  }
 0x14f   :  { %1078 = vmatpush3.bf16.msra.mxu1 %v1075_v57 }
 0x150   :  { %1080 = vmatprep.subr.bf16.mxu1 %v1079_v60 }
 0x153   :  { %1082 = vmatpush3.bf16.msra.mxu1 %v1079_v60 }
 0x154   :  { %1084 = vmatprep.subr.bf16.mxu1 %v1083_v63 }
 0x157   :  { %1086 = vmatpush3.bf16.msra.mxu1 %v1083_v63  ;;  %v702_v63 = vld [vmem:[%s1537_s13] sm:$0x1] }
 0x158   :  { %1088 = vmatprep.subr.bf16.mxu1 %v1087_v2 }
 0x15b   :  { %1090 = vmatpush3.bf16.msra.mxu1 %v1087_v2  ;;  %v711_v2 = vsub.s32 0, %v710_v1 }
 0x15c   :  { %1092 = vmatprep.subr.bf16.mxu1 %v1091_v12 }
 0x15f   :  { %1094 = vmatpush3.bf16.msra.mxu1 %v1091_v12 }
 0x160   :  { %1127 = vmatprep.subr.bf16.mxu1 %v1296_v51 }
 0x215   :  { %v906_v4 = vpop.f32.mrb[2].mxu1 }
 0x216   :  { %v399_v5 = vadd.f32 %v906_v4, %v810_v3  ;;  %v382_v6 = vpop.f32.mrb[3].mxu1 }
 0x217   :  { %v398_v7 = vadd.f32 %v810_v3, %v382_v6  ;;  %v707_v3 = vpop.permute.xlu0 %706 }
 0x218   :  { %v401_v9 = vmax.f32 %v399_v5, 0.0  ;;  %v712_v4 = vrot.slane %v707_v3, %v711_v2 }
 0x219   :  { %v400_v8 = vmax.f32 %v398_v7, 0.0 }
 0x21b   :  { %939 = vmatprep.mubr.f32.mxu0 %v400_v8 }
 0x21c   :  { %940 = vmatmul.mubr.f32.vlgmr.msra.gmra.mrb[0].mxu0 %v401_v9 }
 0x21d   :  { %1098 = vmatpush3.bf16.msra.mxu0 %v1095_v16 }
 0x21e   :  { %1100 = vmatprep.subr.bf16.mxu0 %v1099_v18 }
 0x221   :  { %1102 = vmatpush3.bf16.msra.mxu0 %v1099_v18 }
 0x222   :  { %1104 = vmatprep.subr.bf16.mxu0 %v1103_v21 }
 0x225   :  { %1106 = vmatpush3.bf16.msra.mxu0 %v1103_v21 }
 0x226   :  { %1108 = vmatprep.subr.bf16.mxu0 %v1107_v24 }
 0x229   :  { %1110 = vmatpush3.bf16.msra.mxu0 %v1107_v24 }
 0x22a   :  { %1112 = vmatprep.subr.bf16.mxu0 %v1111_v27 }
 0x22d   :  { %1114 = vmatpush3.bf16.msra.mxu0 %v1111_v27 }
 0x22e   :  { %1116 = vmatprep.subr.bf16.mxu0 %v1115_v30 }
 0x231   :  { %1118 = vmatpush3.bf16.msra.mxu0 %v1115_v30 }
 0x232   :  { %1120 = vmatprep.subr.bf16.mxu0 %v1119_v33 }
 0x235   :  { %1122 = vmatpush3.bf16.msra.mxu0 %v1119_v33 }
 0x236   :  { %1124 = vmatprep.subr.bf16.mxu0 %v1123_v43 }
 0x239   :  { %1126 = vmatpush3.bf16.msra.mxu0 %v1123_v43 }
 0x2ef   :  { %v941_v35 = vpop.f32.mrb[0].mxu0 }
 0x2f0   :  { %v497_v36 = vadd.f32 %v941_v35, %v811_v34  ;;  %v491_v37 = vpop.f32.mrb[1].mxu0 }
 0x2f1   :  { %v492_v38 = vadd.f32 %v811_v34, %v491_v37 }
 0x2f2   :  { %v501_v40 = vmax.f32 %v497_v36, 0.0 }
 0x2f3   :  { %v500_v39 = vmax.f32 %v492_v38, 0.0 }
 0x2f5   :  { %974 = vmatprep.mubr.f32.mxu1 %v500_v39 }
 0x2f6   :  { %975 = vmatmul.mubr.f32.vlgmr.msra.gmra.mrb[4].mxu1 %v501_v40 }
 0x2f7   :  { %1016 = vmatprep.mubr.msk.f32.mxu1 %vm1297_vm4, %v1298_v52 }
 0x3c9   :  { %v976_v45 = vpop.f32.mrb[4].mxu1 }
 0x3ca   :  { %v597_v46 = vadd.f32 %v976_v45, %v812_v44  ;;  %v591_v47 = vpop.f32.mrb[5].mxu1 }
 0x3cb   :  { %v592_v48 = vadd.f32 %v812_v44, %v591_v47 }
 0x3cc   :  { %v601_v50 = vmax.f32 %v597_v46, 0.0 }
 0x3cd   :  { %v600_v49 = vmax.f32 %v592_v48, 0.0 }
 0x3cf   :  { %1009 = vmatprep.mubr.f32.mxu0 %v600_v49 }
 0x3d0   :  { %1010 = vmatmul.mubr.f32.vlgmr.msra.gmra.mrb[2].mxu0 %v601_v50 }
 0x4a3   :  { %v1011_v56 = vpop.f32.mrb[2].mxu0 }
 0x4a4   :  { %v697_v57 = vadd.f32 %v1011_v56, %v813_v55  ;;  %v691_v58 = vpop.f32.mrb[3].mxu0 }
 0x4a5   :  { %v692_v59 = vadd.f32 %v813_v55, %v691_v58 }
 0x4a6   :  { %v701_v60 = vmax.f32 %v697_v57, 0.0 }
 0x4a7   :  { %v700_v61 = vmax.f32 %v692_v59, 0.0 }
 0x4a9   :  { %v1128_v62 = vpack.c.bf16 %v701_v60, %v700_v61 }
 0x4ab   :  { %1129 = vmatpush3.bf16.xpose.msra.mxu1 %v1128_v62 }
 0x4b2   :  { %1017 = vmatmul.mubr.f32.vlgmr.msra.gmra.mrb[6].mxu1 %v702_v63 }
 0x585   :  { %v779_v5 = vpop.f32.mrb[6].mxu1 }
 0x586   :  { %v780_v6 = vadd.f32 %v779_v5, %v712_v4  ;;  %v1018_v7 = vpop.f32.mrb[7].mxu1 }
 0x588   :  { %784 = vst.msk [vmem:[#allocation12] sm:$0x1] %vm783_vm5, %v780_v6 }
 0x589   :  { %1270 = shalt.err (!%p1267_p2)
}
 0x58a   :  { %s1271_s24 = scalar_lea.hbm %s1539_s15, 16 }
 0x58b   :  { %p1272_p3 = scmp.ne.s32.totalorder %s1539_s15, %s1271_s24  ;;  %p1275_p4 = scmp.lt.u32.totalorder %s1271_s24, %s1539_s15 }
 0x58d   :  { %p1277_p5 = pnand %p1275_p4, %p1272_p3 }
 0x58f   :  { %1280 = shalt.err (!%p1277_p5)
}
 0x590   :  { %794 = dma.vmem_to_hbm [thread:$0]  %s792_s12, 16, %s1539_s15, [#allocation5]  }
 0x591   :  { %1287 = dma.done.wait [#allocation5], 16  }
 0x592   :  { %1288 = vsyncadd [#allocation5], 4294967280 }
 0x593   :  { %798 = vsyncpa [#allocation4], 1 }
 0x594   :  { %799 = vsyncpa [#allocation7], 1 }
 0x595   :  { %800 = vsyncpa [#allocation10], 1 }
 0x596   :  { %801 = vsyncpa [#allocation5], 1 }

</bundles_post_ra>
